<compile_context>
chip_gen: v6e
topology: v6e:2x2x1
jax: 0.10.0
libtpu: 0.0.40
codegen_flags: <defaults>
</compile_context>

<pallas_src>
import functools
import math

import jax
import jax.numpy as jnp
import numpy as np
from jax.experimental import pallas as pl
from jax.experimental.pallas import tpu as pltpu


def _hash_u32(x):
    """murmur3-style finalizer: uint32 counter -> well-mixed uint32 bits."""
    x = x ^ (x >> 16)
    x = x * jnp.uint32(0x7FEB352D)
    x = x ^ (x >> 15)
    x = x * jnp.uint32(0x846CA68B)
    x = x ^ (x >> 16)
    return x


def pos_encoding_kernel(seed_ref, x_ref, pe_ref, o_ref, *, dropout_p):
    """One grid step: (1, TS, D) tile of x + (TS, D) tile of pe, then dropout."""
    if dropout_p >= 1.0:
        # nn.Dropout(p=1.0) zeroes everything in training mode.
        o_ref[0] = jnp.zeros_like(o_ref[0])
        return

    val = x_ref[0] + pe_ref[...]                       # (TS, D), IO dtype

    if dropout_p > 0.0:
        ts, d = val.shape
        b = pl.program_id(0)
        s = pl.program_id(1)
        n_s = pl.num_programs(1)

        # Unique per-element counter: (seed, tile_id, row, col) -> uint32 bits.
        row = jax.lax.broadcasted_iota(jnp.int32, (ts, d), 0).astype(jnp.uint32)
        col = jax.lax.broadcasted_iota(jnp.int32, (ts, d), 1).astype(jnp.uint32)
        tile_id = (b * n_s + s).astype(jnp.uint32)
        base = (seed_ref[0].astype(jnp.uint32) * jnp.uint32(0x9E3779B9)
                + tile_id * jnp.uint32(ts * d))
        bits = _hash_u32(base + row * jnp.uint32(d) + col)

        # keep with prob (1 - p): unsigned integer threshold, no float convert.
        thresh = jnp.uint32(min(int(round(dropout_p * 2.0 ** 32)), 2 ** 32 - 1))
        keep = bits >= thresh
        scale = jnp.asarray(1.0 / (1.0 - dropout_p), dtype=val.dtype)
        val = jnp.where(keep, val * scale, jnp.zeros_like(val))

    o_ref[0] = val.astype(o_ref.dtype)


def _make_pe(seq_len, d_model, dtype):
    """Sinusoidal positional-encoding buffer, exactly as in the module."""
    position = jnp.arange(seq_len, dtype=jnp.float32)[:, None]
    div_term = jnp.exp(jnp.arange(0, d_model, 2, dtype=jnp.float32)
                       * (-math.log(1000.0) / d_model))
    pe = jnp.zeros((seq_len, d_model), dtype=jnp.float32)
    pe = pe.at[:, 0::2].set(jnp.sin(position * div_term))
    pe = pe.at[:, 1::2].set(jnp.cos(position * div_term))
    return pe.astype(dtype)


def _choose_seq_tile(S, D, itemsize, max_bytes=8 * 1024 * 1024):
    """Largest seq tile such that double-buffered (x-in + out) fits the budget."""
    max_rows = max(8, max_bytes // max(1, D * itemsize * 4))
    if S <= max_rows:
        return S                       # full dim: always a legal block
    ts = (max_rows // 128) * 128       # prefer 128-aligned rows
    if ts == 0:
        ts = (max_rows // 8) * 8       # fall back to sublane multiple
    return max(8, ts)


def positional_encoding(x, pe, seed, *, dropout_p):
    """x: (B, S, D); pe: (>=S, D) in x.dtype; seed: (1,) int32."""
    B, S, D = x.shape
    pe = pe[:S]
    ts = _choose_seq_tile(S, D, x.dtype.itemsize)
    grid = (B, pl.cdiv(S, ts))

    kernel = functools.partial(pos_encoding_kernel, dropout_p=float(dropout_p))
    itemsize = x.dtype.itemsize
    cost = pl.CostEstimate(
        flops=B * S * D,
        transcendentals=0,
        bytes_accessed=(2 * B * S * D + S * D) * itemsize,
    )
    return pl.pallas_call(
        kernel,
        out_shape=jax.ShapeDtypeStruct((B, S, D), x.dtype),
        grid=grid,
        in_specs=[
            pl.BlockSpec(memory_space=pltpu.MemorySpace.SMEM),    # seed (1,)
            pl.BlockSpec((1, ts, D), lambda b, s: (b, s, 0)),     # x
            pl.BlockSpec((ts, D), lambda b, s: (s, 0)),           # pe
        ],
        out_specs=pl.BlockSpec((1, ts, D), lambda b, s: (b, s, 0)),
        compiler_params=pltpu.CompilerParams(
            dimension_semantics=("parallel", "parallel"),
            vmem_limit_bytes=32 * 1024 * 1024,
        ),
        cost_estimate=cost,
    )(seed, x, pe)


if __name__ == "__main__":
    key = jax.random.PRNGKey(0)

    # Small shapes consistent with the module: (batch, seq_len, d_model).
    B, S, D = 2, 64, 128
    drop_out = 0.1

    x = jax.random.normal(key, (B, S, D), dtype=jnp.float32)
    pe = _make_pe(seq_len=S, d_model=D, dtype=x.dtype)
    seed = jnp.array([1234], dtype=jnp.int32)

    # Deterministic path (dropout disabled) must match x + pe exactly.
    out_nodrop = positional_encoding(x, pe, seed, dropout_p=0.0)
    jax.block_until_ready(out_nodrop)
    ref = x + pe[None, :S, :]
    np.testing.assert_allclose(np.asarray(out_nodrop), np.asarray(ref),
                               rtol=1e-6, atol=1e-6)

    # Training-mode dropout path (stochastic, in-kernel counter hash).
    out = positional_encoding(x, pe, seed, dropout_p=drop_out)
    jax.block_until_ready(out)
    # Sanity: surviving elements equal (x + pe) / (1 - p); dropped are zero.
    scaled_ref = np.asarray(ref) / (1.0 - drop_out)
    out_np = np.asarray(out)
    ok = np.isclose(out_np, scaled_ref, rtol=1e-5, atol=1e-5) | (out_np == 0.0)
    assert ok.all()
    # Drop rate should be roughly p (loose bound; avoids flaky failures).
    drop_frac = float((out_np == 0.0).mean())
    assert 0.02 < drop_frac < 0.25, drop_frac

    print("KERNEL_OK")
</pallas_src>

<mosaic_0001>
module attributes {stable_mosaic.version = 11 : i64} {
  func.func @pos_encoding_kernel(%arg0: i32, %arg1: i32, %arg2: memref<1xi32, #tpu.memory_space<smem>>, %arg3: memref<1x64x128xf32, #tpu.memory_space<vmem>>, %arg4: memref<64x128xf32, #tpu.memory_space<vmem>>, %arg5: memref<1x64x128xf32, #tpu.memory_space<vmem>>) attributes {dimension_semantics = [#tpu.dimension_semantics<parallel>, #tpu.dimension_semantics<parallel>], iteration_bounds = array<i64: 2, 1>, scalar_prefetch = 0 : i64, scratch_operands = 0 : i64, tpu.core_type = #tpu.core_type<tc>, window_params = [{transform_indices = @transform_0, window_bounds = array<i64: 1>}, {transform_indices = @transform_1, window_bounds = array<i64: 1, 64, 128>}, {transform_indices = @transform_2, window_bounds = array<i64: 64, 128>}, {transform_indices = @transform_3, window_bounds = array<i64: 1, 64, 128>}]} {
    %c0 = arith.constant 0 : index
    %c0_0 = arith.constant 0 : index
    %c0_1 = arith.constant 0 : index
    %0 = vector.load %arg3[%c0, %c0_0, %c0_1] : memref<1x64x128xf32, #tpu.memory_space<vmem>>, vector<1x64x128xf32>
    %1 = vector.shape_cast %0 : vector<1x64x128xf32> to vector<64x128xf32>
    %c0_2 = arith.constant 0 : index
    %c0_3 = arith.constant 0 : index
    %2 = vector.load %arg4[%c0_2, %c0_3] : memref<64x128xf32, #tpu.memory_space<vmem>>, vector<64x128xf32>
    %3 = arith.addf %1, %2 : vector<64x128xf32>
    %c0_4 = arith.constant 0 : index
    %c0_5 = arith.constant 0 : index
    %c0_6 = arith.constant 0 : index
    %4 = vector.load %arg5[%c0_4, %c0_5, %c0_6] : memref<1x64x128xf32, #tpu.memory_space<vmem>>, vector<1x64x128xf32>
    %5 = vector.shape_cast %4 : vector<1x64x128xf32> to vector<64x128xf32>
    %6 = vector.shape_cast %3 : vector<64x128xf32> to vector<1x64x128xf32>
    tpu.vector_store %arg5[%c0_4, %c0_5, %c0_6], %6 {strides = array<i32>} : memref<1x64x128xf32, #tpu.memory_space<vmem>>, vector<1x64x128xf32>,
    return
  }
  func.func @transform_0(%arg0: i32, %arg1: i32) -> i32 {
    %c0_i32 = arith.constant 0 : i32
    %c0_i32_0 = arith.constant 0 : i32
    return %c0_i32 : i32
  }
  func.func @transform_1(%arg0: i32, %arg1: i32) -> (i32, i32, i32) {
    %c0_i32 = arith.constant 0 : i32
    %c0_i32_0 = arith.constant 0 : i32
    return %arg0, %arg1, %c0_i32 : i32, i32, i32
  }
  func.func @transform_2(%arg0: i32, %arg1: i32) -> (i32, i32) {
    %c0_i32 = arith.constant 0 : i32
    %c0_i32_0 = arith.constant 0 : i32
    return %arg1, %c0_i32 : i32, i32
  }
  func.func @transform_3(%arg0: i32, %arg1: i32) -> (i32, i32, i32) {
    %c0_i32 = arith.constant 0 : i32
    %c0_i32_0 = arith.constant 0 : i32
    return %arg0, %arg1, %c0_i32 : i32, i32, i32
  }
}

</mosaic_0001>

<bundles_post_ra>
// kernel: tpu_custom_call.1
= control target key start
LH: loop header
LB: loop body
LE: loop exit
PB: predicated region body
PF: predicated region fallthrough
CT: control target
= control target key end

     0   :  { %9 = vsyncpa [#allocation4], 0  ;;  %s841_s0 = inlined_call_operand.<no memory space> [shape: s32[1], index: 0, kind: input, shape index: {}]   ;;  %s842_s1 = inlined_call_operand.hbm [shape: f32[2,64,128], index: 1, kind: input, shape index: {}]   ;;  %s843_s2 = inlined_call_operand.hbm [shape: f32[64,128], index: 2, kind: input, shape index: {}]   ;;  %s844_s3 = inlined_call_operand.hbm [shape: f32[2,64,128], index: 3, kind: output, shape index: {}]  }
   0x1   :  { %11 = vsyncpa [#allocation4 + $0x1], 0 }
   0x2   :  { %12 = vsyncpa [#allocation7], 0 }
   0x3   :  { %13 = vsyncpa [#allocation5], 0 }
   0x4   :  { %15 = vsyncpa [#allocation5 + $0x1], 0  ;;  %s644_s12 = smov 0   ;;  %s646_s13 = smov 0  }
   0x5   :  { %s648_s14 = smov 0   ;;  %s650_s0 = smov 0  }
   0x6   :  { %s652_s15 = smov 0   ;;  %s654_s16 = smov 0  }
   0x7 LB: > { %s381_s17 = sadd.s32 4294967295, %s615_s16   ;;  %s382_s18 = sadd.s32 4294967294, %s615_s16   ;;  %s615_s16 = sphi %s654_s16, %s21_s16   ;;  %s611_s15 = sphi %s652_s15, %s864_s15   ;;  %s607_s0 = sphi %s650_s0, %s863_s0   ;;  %s603_s14 = sphi %s648_s14, %s862_s14   ;;  %s599_s13 = sphi %s646_s13, %s861_s13   ;;  %s595_s12 = sphi %s644_s12, %s860_s12  }
   0x8   : > { %p76_p0 = scmp.ne.s32.totalorder %s599_s13, %s595_s12  ;;  %p678_p1 = scmp.eq.s32.totalorder %s381_s17, 0 }
   0x9   : > { %p682_p2 = scmp.eq.s32.totalorder %s381_s17, 1  ;;  %p134_p3 = scmp.eq.s32.totalorder %s382_s18, 1 }
   0xa   : > { %p688_p4 = por %p678_p1, %p76_p0  ;;  %p383_p5 = scmp.ge.s32.totalorder %s615_s16, 1 }
   0xb   : > { %p693_p6 = por %p134_p3, %p76_p0  ;;  %p141_p7 = scmp.lt.s32.totalorder %s615_s16, 3 }
   0xc   : > { %s849_s21 = scalar_select %p688_p4, 1, 0 }
   0xd   : > { %s850_s22 = scalar_select %p693_p6, 1, 0 }
   0xe   : > { %p698_p8 = pnand %p383_p5, %p141_p7  ;;  %s617_s24 = smov [#allocation6]  }
   0xf   : > { %s159_s25 = sshll.u32 %s617_s24, 4  ;;  %s33_s27 = sadd.s32 1, %s611_s15  ;;  %s160_s25 = int_to_ptr.vmem [resolvable:$true] %s159_s25 }
  0x10   : > { %p408_p9 = pneg %p698_p8  ;;  %s488_s28 = scalar_lea.vmem %s160_s25, 1024 }
  0x11   : > { %p489_p13 = scmp.ne.s32.totalorder %s160_s25, %s488_s28  ;;  %p496_p5 = scmp.lt.s32.totalorder %s160_s25, %s160_s25 }
  0x12   : > { %p707_p11 = pnand %p408_p9, %p678_p1  ;;  %p497_p7 = scmp.lt.s32.totalorder %s488_s28, %s488_s28 }
  0x14   : > { %p479_p12 = pneg %p707_p11  ;;  %p498_p6 = por %p497_p7, %p496_p5 }
  0x16   : > { %p491_p0 = pnand %p489_p13, %p479_p12 }
  0x18   : > { %p492_p3 = pneg %p491_p0 }
  0x1a   : > { %p499_p4 = pnand %p498_p6, %p492_p3 }
  0x1c   : > { %502 = shalt.err (!%p499_p4)
}
  0x1d   : > { %s846_s29 = smov 128   ;;  %s619_s30 = smov 8  }
  0x1e   : > { %411 = dma.hbm_to_vmem [thread:$0]  (!%p707_p11), %s843_s2, 1024, %s160_s25, [#allocation7], %s846_s29, %s846_s29, %s619_s30  }
  0x1f   : > { %p35_p4 = scmp.ge.s32.totalorder %s33_s27, 2  ;;  %s63_s6 = sadd.s32 1, %s603_s14 }
  0x20   : > { %p70_p6 = scmp.ne.s32.totalorder %s603_s14, %s599_s13  ;;  %p71_p9 = scmp.eq.s32.totalorder %s615_s16, 0 }
  0x21   : > { %s866_s27 = smov (%p35_p4, %s33_s27), 0  ;;  %p421_p0 = scmp.lt.s32.totalorder %s615_s16, 2 }
  0x22   : > { %p728_p12 = por %p71_p9, %p70_p6  ;;  %p734_p13 = por %p682_p2, %p70_p6 }
  0x23   : > { %s58_s9 = ssub.s32 %s611_s15, %s866_s27  ;;  %s173_s10 = sand.u32 1, %s603_s14  }
  0x24   : > { %p61_p11 = scmp.eq.s32.totalorder %s58_s9, 0  ;;  %s386_s11 = sshll.u32 %s173_s10, 6 }
  0x25   : > { %s398_s18 = sshll.u32 %s611_s15, 10  ;;  %s177_s28 = scalar_lea.vmem [#allocation3], %s386_s11 }
  0x26   : > { %s743_s17 = scalar_select %p61_p11, %s603_s14, %s63_s6  }
  0x27   : > { %s185_s26 = scalar_lea.hbm %s842_s1, %s398_s18  ;;  %s186_s4 = sshll.u32 %s177_s28, 4  ;;  %s187_s4 = int_to_ptr.vmem [resolvable:$true] %s186_s4 }
  0x28   : > { %p751_p2 = pnand %p421_p0, %p728_p12  ;;  %s174_s5 = scalar_lea.sflag [#allocation4], %s173_s10 }
  0x29   : > { %s516_s9 = scalar_lea.vmem %s187_s4, 1024  ;;  %s620_s6 = smov [#allocation3]  }
  0x2a   : > { %p505_p3 = pneg %p751_p2  ;;  %p517_p5 = scmp.ne.s32.totalorder %s187_s4, %s516_s9 }
  0x2b   : > { %s521_s29 = sshll.u32 %s620_s6, 4  ;;  %s522_s29 = int_to_ptr.vmem [resolvable:$false] %s521_s29 }
  0x2c   : > { %p519_p7 = pnand %p517_p5, %p505_p3  ;;  %s523_s18 = scalar_lea.vmem %s522_s29, 2048 }
  0x2d   : > { %p524_p6 = scmp.lt.s32.totalorder %s187_s4, %s522_s29  ;;  %p525_p9 = scmp.lt.s32.totalorder %s523_s18, %s516_s9 }
  0x2e   : > { %p520_p4 = pneg %p519_p7 }
  0x2f   : > { %p526_p11 = por %p525_p9, %p524_p6 }
  0x31   : > { %p527_p10 = pnand %p526_p11, %p520_p4 }
  0x33   : > { %530 = shalt.err (!%p527_p10)
}
  0x34   : > { %s856_s7 = smov 128   ;;  %198 = sbr.rel (%p698_p8) target bundleno = 85 (0x55), region = 32 }
  0x35   : > { %415 = dma.hbm_to_vmem [thread:$0]  (!%p751_p2), %s185_s26, 1024, %s187_s4, %s174_s5, %s856_s7, %s856_s7, %s619_s30  }
  0x36   : > { %s765_s10 = sand.u32 (!%p698_p8), 1, %s599_s13   ;;  %p857_p10 = scmp.ne.s32.totalorder (!%p698_p8), %s849_s21, 0 }
  0x37   : > { %s390_s29 = sshll.u32 (!%p698_p8), %s765_s10, 6  ;;  %s201_s11 = scalar_lea.sflag (!%p698_p8), [#allocation4], %s765_s10 }
  0x38   : > { %s769_s24 = scalar_lea.vmem (!%p698_p8), [#allocation3], %s390_s29 }
  0x39   : > { %582 = dma.done.wait (%p857_p10), %s201_s11, 1024  }
  0x3a   : > { %584 = vsyncadd (%p857_p10), %s201_s11, 4294966272 }
  0x3b   : > { %586 = dma.done.wait (%p678_p1), [#allocation7], 1024  }
  0x3c   : > { %588 = vsyncadd (%p678_p1), [#allocation7], 4294966272  ;;  %v234_v0 = vld [vmem:[%s769_s24] sm:$0xff]  ;;  %v235_v2 = vld [vmem:[%s769_s24 + $0x8] sm:$0xff]  ;;  %s230_s21 = scalar_lea.vmem [#allocation8], %s390_s29  ;;  %s399_s19 = sshll.u32 %s607_s0, 10 }
  0x3d   : > { %v242_v1 = vld [vmem:[#allocation6] sm:$0xff]  ;;  %v243_v4 = vld [vmem:[#allocation6 + $0x8] sm:$0xff]  ;;  %v236_v5 = vld [vmem:[%s769_s24 + $0x10] sm:$0xff]  ;;  %s282_s23 = sshll.u32 %s230_s21, 4  ;;  %s793_s25 = scalar_lea.hbm %s844_s3, %s399_s19  ;;  %s788_s23 = int_to_ptr.vmem [resolvable:$true] %s282_s23 }
  0x3e   : > { %v250_v3 = vadd.f32 %v242_v1, %v234_v0  ;;  %v244_v6 = vld [vmem:[#allocation6 + $0x10] sm:$0xff]  ;;  %v251_v7 = vadd.f32 %v243_v4, %v235_v2  ;;  %v237_v9 = vld [vmem:[%s769_s24 + $0x18] sm:$0xff]  ;;  %v238_v11 = vld [vmem:[%s769_s24 + $0x20] sm:$0xff]  ;;  %s267_s26 = scalar_lea.sflag [#allocation5], %s765_s10  ;;  %s531_s28 = scalar_lea.vmem %s788_s23, 1024 }
  0x3f   : > { %v252_v8 = vadd.f32 %v244_v6, %v236_v5  ;;  %v245_v10 = vld [vmem:[#allocation6 + $0x18] sm:$0xff]  ;;  %v246_v13 = vld [vmem:[#allocation6 + $0x20] sm:$0xff]  ;;  %v239_v14 = vld [vmem:[%s769_s24 + $0x28] sm:$0xff]  ;;  %p532_p1 = scmp.ne.s32.totalorder %s788_s23, %s531_s28  ;;  %s621_s4 = smov [#allocation8]  }
  0x40   : > { %258 = vst [vmem:[%s230_s21] sm:$0xff] %v250_v3  ;;  %v253_v12 = vadd.f32 %v245_v10, %v237_v9  ;;  %v247_v15 = vld [vmem:[#allocation6 + $0x28] sm:$0xff]  ;;  %259 = vst [vmem:[%s230_s21 + $0x8] sm:$0xff] %v251_v7  ;;  %v254_v16 = vadd.f32 %v246_v13, %v238_v11  ;;  %v240_v18 = vld [vmem:[%s769_s24 + $0x30] sm:$0xff]  ;;  %s535_s20 = sshll.u32 %s621_s4, 4  ;;  %s536_s20 = int_to_ptr.vmem [resolvable:$false] %s535_s20 }
  0x41   : > { %260 = vst [vmem:[%s230_s21 + $0x10] sm:$0xff] %v252_v8  ;;  %v255_v17 = vadd.f32 %v247_v15, %v239_v14  ;;  %v248_v19 = vld [vmem:[#allocation6 + $0x30] sm:$0xff]  ;;  %v241_v20 = vld [vmem:[%s769_s24 + $0x38] sm:$0xff]  ;;  %p533_p8 = pnand %p532_p1, %p734_p13  ;;  %s537_s5 = scalar_lea.vmem %s536_s20, 2048 }
  0x42   : > { %261 = vst [vmem:[%s230_s21 + $0x18] sm:$0xff] %v253_v12  ;;  %v256_v21 = vadd.f32 %v248_v19, %v240_v18  ;;  %v249_v22 = vld [vmem:[#allocation6 + $0x38] sm:$0xff]  ;;  %262 = vst [vmem:[%s230_s21 + $0x20] sm:$0xff] %v254_v16  ;;  %p538_p0 = scmp.lt.s32.totalorder %s788_s23, %s536_s20  ;;  %p539_p2 = scmp.lt.s32.totalorder %s537_s5, %s531_s28 }
  0x43   : > { %263 = vst [vmem:[%s230_s21 + $0x28] sm:$0xff] %v255_v17  ;;  %v257_v23 = vadd.f32 %v249_v22, %v241_v20  ;;  %p534_p12 = pneg %p533_p8 }
  0x44   : > { %264 = vst [vmem:[%s230_s21 + $0x30] sm:$0xff] %v256_v21  ;;  %p540_p3 = por %p539_p2, %p538_p0 }
  0x45   : > { %265 = vst [vmem:[%s230_s21 + $0x38] sm:$0xff] %v257_v23 }
  0x46   : > { %p541_p5 = pnand %p540_p3, %p534_p12 }
  0x48   : > { %544 = shalt.err (!%p541_p5)
}
  0x49   : > { %s545_s9 = scalar_lea.hbm %s793_s25, 1024  ;;  %s549_s7 = scalar_lea.hbm %s844_s3, 2048 }
  0x4a   : > { %p546_p7 = scmp.ne.s32.totalorder %s793_s25, %s545_s9  ;;  %p550_p9 = scmp.lt.s32.totalorder %s793_s25, %s844_s3 }
  0x4b   : > { %p551_p11 = scmp.lt.s32.totalorder %s549_s7, %s545_s9 }
  0x4c   : > { %p547_p4 = pnand %p546_p7, %p734_p13 }
  0x4d   : > { %p552_p10 = por %p551_p11, %p550_p9 }
  0x4e   : > { %p548_p6 = pneg %p547_p4 }
  0x50   : > { %p553_p1 = pnand %p552_p10, %p548_p6 }
  0x52   : > { %556 = shalt.err (!%p553_p1)
}
  0x53   : > { %s622_s24 = smov 128   ;;  %s623_s21 = smov 8  }
  0x54   : > { %406 = dma.vmem_to_hbm [thread:$0]  (%p734_p13), %s788_s23, 1024, %s793_s25, %s267_s26, %s622_s24, %s622_s24, %s623_s21  }
  0x55 PF: > { %s297_s19 = sand.u32 1, %s595_s12   ;;  %p858_p8 = scmp.ne.s32.totalorder %s850_s22, 0 }
  0x56   : > { %p859_p12 = scmp.ge.s32.totalorder %s615_s16, 2  ;;  %s298_s0 = scalar_lea.sflag [#allocation5], %s297_s19 }
  0x58   : > { %p417_p0 = pnand %p859_p12, %p858_p8 }
  0x5a   : > { %p418_p2 = pneg %p417_p0 }
  0x5c   : > { %590 = dma.done.wait (%p418_p2), %s298_s0, 1024  }
  0x5d   : > { %592 = vsyncadd (%p418_p2), %s298_s0, 4294966272  ;;  %s21_s16 = sadd.s32 1, %s615_s16   ;;  %s860_s12 = smov %s599_s13 }
  0x5e   : > { %p18_p3 = scmp.ge.s32.totalorder %s21_s16, 4   ;;  %s861_s13 = smov %s603_s14 }
  0x5f   : > { %s862_s14 = smov %s743_s17  ;;  %s863_s0 = smov %s611_s15 }
  0x60   : > { %s864_s15 = smov %s866_s27  ;;  %20 = sbr.rel (!%p18_p3) target bundleno = 7 (0x7), region = 82 }
  0x65   :  { %303 = vsyncpa [#allocation4], 1 }
  0x66   :  { %305 = vsyncpa [#allocation4 + $0x1], 1 }
  0x67   :  { %306 = vsyncpa [#allocation7], 1 }
  0x68   :  { %307 = vsyncpa [#allocation5], 1 }
  0x69   :  { %309 = vsyncpa [#allocation5 + $0x1], 1 }

</bundles_post_ra>
